<compile_context>
chip_gen: v7x
topology: tpu7x:2x2x1
jax: 0.10.0
libtpu: 0.0.40
codegen_flags: <defaults>
</compile_context>

<pallas_src>
import functools

import jax
import jax.numpy as jnp
from jax import lax
from jax.experimental import pallas as pl
from jax.experimental.pallas import tpu as pltpu


def _round_up(x, m):
    return (x + m - 1) // m * m


def _shared_exp_sigmoid(pred):
    """One EUP exp per element: returns (exp(-|pred|), sigmoid(pred))."""
    e = jnp.exp(-jnp.abs(pred))
    inv = 1.0 / (1.0 + e)
    sig = jnp.where(pred >= 0.0, inv, e * inv)
    return e, sig


def _bin_select(pred, target, lw, bins):
    """Per-element bin index in [0, bins); invalid elements -> `bins` (no bin)."""
    _, sig = _shared_exp_sigmoid(pred)
    g = jnp.abs(sig - target)
    valid = lw > 0.0
    bidx = jnp.minimum(jnp.floor(g * bins), bins - 1).astype(jnp.int32)
    return jnp.where(valid, bidx, bins), valid


def _ghmc_hist_kernel(pred_ref, target_ref, lw_ref, wbin_ref, cnt_ref, *, bins):
    """Pass 1: accumulate the global gradient-norm histogram into SMEM scalars;
    on the last grid step emit per-bin weights tot/(count*n) on lanes 0..bins-1."""
    step = pl.program_id(0)

    @pl.when(step == 0)
    def _init():
        for b in range(bins + 1):
            cnt_ref[b] = 0.0

    pred = pred_ref[...]
    target = target_ref[...]
    lw = lw_ref[...]

    bsel, valid = _bin_select(pred, target, lw, bins)
    vf = valid.astype(jnp.float32)

    for b in range(bins):
        cnt_ref[b] = cnt_ref[b] + jnp.sum(jnp.where(bsel == b, 1.0, 0.0))
    cnt_ref[bins] = cnt_ref[bins] + jnp.sum(vf)   # tot (valid count)

    @pl.when(step == pl.num_programs(0) - 1)
    def _finalize():
        tot = jnp.maximum(cnt_ref[bins], 1.0)
        n_nonempty = jnp.float32(0.0)
        for b in range(bins):
            n_nonempty = n_nonempty + jnp.where(cnt_ref[b] > 0.0, 1.0, 0.0)
        n_div = jnp.maximum(n_nonempty, 1.0)      # fold final 1/n into each bin weight
        lane = lax.broadcasted_iota(jnp.int32, (1, 128), 1)
        w = jnp.zeros((1, 128), jnp.float32)
        for b in range(bins):
            c = cnt_ref[b]
            w_b = jnp.where(c > 0.0, tot / (jnp.maximum(c, 1.0) * n_div), 0.0)
            w = jnp.where(lane == b, w_b, w)
        wbin_ref[...] = w


def _ghmc_loss_kernel(wbin_ref, pred_ref, target_ref, lw_ref, out_ref,
                      *, bins, loss_weight):
    """Pass 2: per-element GHM weights + stable BCE-with-logits + class-axis sum
    (done on the MXU), written as a lane-dense (1, TM) block."""
    pred = pred_ref[...]
    target = target_ref[...]
    lw = lw_ref[...]

    e, sig = _shared_exp_sigmoid(pred)
    g = jnp.abs(sig - target)
    valid = lw > 0.0
    bidx = jnp.minimum(jnp.floor(g * bins), bins - 1).astype(jnp.int32)
    bsel = jnp.where(valid, bidx, bins)

    # Per-element weight via eq+select chain against the per-bin scalars.
    # Invalid / padded elements keep weight 0 (bsel == bins never matches).
    w = jnp.zeros_like(pred)
    for b in range(bins):
        w = jnp.where(bsel == b, wbin_ref[0, b], w)

    # Stable BCE-with-logits, reusing the shared exp(-|pred|).
    bce = jnp.maximum(pred, 0.0) - pred * target + jnp.log(1.0 + e)
    loss = bce * w

    # Lane-dense per-row sums: contract the class axis on the MXU -> (1, TM).
    ones_row = jnp.ones((1, loss.shape[1]), jnp.float32)
    row_sums = lax.dot_general(
        ones_row, loss,
        dimension_numbers=(((1,), (1,)), ((), ())),
        preferred_element_type=jnp.float32)
    out_ref[...] = row_sums * loss_weight


def _choose_row_tile(n_rows, c_pad, vmem_budget_bytes=8 << 20):
    """Largest row tile (<= 512 rows, multiple of 128 when multiple tiles are
    needed) whose double-buffered f32 inputs (3 arrays) fit the VMEM budget —
    conservative enough for v5e's 16 MiB scoped VMEM and v7x's 64 MiB VMEM."""
    per_row_bytes = 3 * 2 * c_pad * 4
    cap = min(512, max(128, (vmem_budget_bytes // per_row_bytes) // 128 * 128))
    if n_rows <= cap:
        return _round_up(n_rows, 8), 1          # single tile: block == padded array
    return cap, -(-n_rows // cap)


def ghmc_loss(pred, target, label_weight, *, bins=10, loss_weight=1.0):
    """GHM-C loss (momentum == 0). pred/target/label_weight: [N, C] float32.
    Returns the per-sample loss of shape [N] (class-summed, * loss_weight)."""
    assert pred.shape == target.shape == label_weight.shape
    n, c = pred.shape

    c_pad = _round_up(max(c, 1), 128)           # lane-dense class axis
    tm, n_tiles = _choose_row_tile(n, c_pad)
    n_pad = tm * n_tiles

    def pad2(x):
        return jnp.pad(x.astype(jnp.float32), ((0, n_pad - n), (0, c_pad - c)))

    pred_p = pad2(pred)
    target_p = pad2(target)
    lw_p = pad2(label_weight)                   # padded entries: label_weight = 0

    # ---- pass 1: global histogram -> per-bin weights (1, 128) ---------------
    wbin = pl.pallas_call(
        functools.partial(_ghmc_hist_kernel, bins=bins),
        out_shape=jax.ShapeDtypeStruct((1, 128), jnp.float32),
        grid_spec=pltpu.PrefetchScalarGridSpec(
            num_scalar_prefetch=0,
            grid=(n_tiles,),
            in_specs=[
                pl.BlockSpec((tm, c_pad), lambda i: (i, 0)),
                pl.BlockSpec((tm, c_pad), lambda i: (i, 0)),
                pl.BlockSpec((tm, c_pad), lambda i: (i, 0)),
            ],
            out_specs=pl.BlockSpec((1, 128), lambda i: (0, 0)),
            scratch_shapes=[pltpu.SMEM((bins + 1,), jnp.float32)],
        ),
        compiler_params=pltpu.CompilerParams(
            dimension_semantics=("arbitrary",)),
    )(pred_p, target_p, lw_p)

    # ---- pass 2: weights + BCE + lane-dense per-row sums --------------------
    loss_rows = pl.pallas_call(
        functools.partial(_ghmc_loss_kernel, bins=bins, loss_weight=loss_weight),
        out_shape=jax.ShapeDtypeStruct((1, n_pad), jnp.float32),
        grid_spec=pltpu.PrefetchScalarGridSpec(
            num_scalar_prefetch=0,
            grid=(n_tiles,),
            in_specs=[
                pl.BlockSpec((1, 128), lambda i: (0, 0)),
                pl.BlockSpec((tm, c_pad), lambda i: (i, 0)),
                pl.BlockSpec((tm, c_pad), lambda i: (i, 0)),
                pl.BlockSpec((tm, c_pad), lambda i: (i, 0)),
            ],
            out_specs=pl.BlockSpec((1, tm), lambda i: (0, i)),
        ),
        compiler_params=pltpu.CompilerParams(
            dimension_semantics=("parallel",)),
    )(wbin, pred_p, target_p, lw_p)

    return loss_rows[0, :n]


def _ghmc_reference(pred, target, label_weight, *, bins=10, loss_weight=1.0):
    """Pure-JAX transcription of the PyTorch GHMC.forward (momentum == 0)."""
    edges = [i / bins for i in range(bins + 1)]
    edges[-1] += 1e-6
    sig = jax.nn.sigmoid(pred)
    g = jnp.abs(sig - target)
    valid = label_weight > 0
    tot = jnp.maximum(jnp.sum(valid.astype(jnp.float32)), 1.0)
    weights = jnp.zeros_like(pred)
    n = jnp.float32(0.0)
    for i in range(bins):
        inds = (g >= edges[i]) & (g < edges[i + 1]) & valid
        num = jnp.sum(inds.astype(jnp.float32))
        has = num > 0
        weights = jnp.where(inds & has, tot / jnp.maximum(num, 1.0), weights)
        n = n + jnp.where(has, 1.0, 0.0)
    weights = jnp.where(n > 0, weights / jnp.maximum(n, 1.0), weights)
    bce = jnp.maximum(pred, 0.0) - pred * target + jnp.log1p(jnp.exp(-jnp.abs(pred)))
    return jnp.sum(bce * weights, axis=1) * loss_weight


if __name__ == "__main__":
    key = jax.random.PRNGKey(0)
    k1, k2, k3 = jax.random.split(key, 3)

    N, C = 8, 32   # [batch_num, class_num] — FC-layer output convention
    pred = jax.random.normal(k1, (N, C), dtype=jnp.float32) * 2.0
    target = (jax.random.uniform(k2, (N, C)) > 0.5).astype(jnp.float32)
    label_weight = (jax.random.uniform(k3, (N, C)) > 0.1).astype(jnp.float32)

    loss = ghmc_loss(pred, target, label_weight, bins=10, loss_weight=1.0)
    loss = jax.block_until_ready(loss)

    assert loss.shape == (N,)
    assert bool(jnp.all(jnp.isfinite(loss)))

    # correctness check against a pure-JAX transcription of the PyTorch forward
    ref = _ghmc_reference(pred, target, label_weight, bins=10, loss_weight=1.0)
    err = float(jnp.max(jnp.abs(loss - ref)))
    scale = float(jnp.maximum(jnp.max(jnp.abs(ref)), 1.0))
    assert err <= 1e-3 * scale + 1e-4, f"mismatch vs reference: {err} (scale {scale})"

    print("KERNEL_OK")
</pallas_src>

<mosaic_0001>
module attributes {stable_mosaic.version = 11 : i64} {
  func.func @_ghmc_hist_kernel(%arg0: i32, %arg1: memref<8x128xf32, #tpu.memory_space<vmem>>, %arg2: memref<8x128xf32, #tpu.memory_space<vmem>>, %arg3: memref<8x128xf32, #tpu.memory_space<vmem>>, %arg4: memref<1x128xf32, #tpu.memory_space<vmem>>, %arg5: memref<11xf32, #tpu.memory_space<smem>>) attributes {dimension_semantics = [#tpu.dimension_semantics<arbitrary>], iteration_bounds = array<i64: 1>, scalar_prefetch = 0 : i64, scratch_operands = 1 : i64, tpu.core_type = #tpu.core_type<tc>, window_params = [{transform_indices = @transform_0, window_bounds = array<i64: 8, 128>}, {transform_indices = @transform_1, window_bounds = array<i64: 8, 128>}, {transform_indices = @transform_2, window_bounds = array<i64: 8, 128>}, {pipeline_mode = #tpu.pipeline_mode<synchronous>, transform_indices = @transform_3, window_bounds = array<i64: 1, 128>}]} {
    %c0_i32 = arith.constant 0 : i32
    %0 = arith.cmpi eq, %arg0, %c0_i32 : i32
    %1 = arith.extui %0 : i1 to i32
    %c0_i32_0 = arith.constant 0 : i32
    %2 = arith.cmpi ne, %1, %c0_i32_0 : i32
    scf.if %2 {
      %cst_58 = arith.constant 0.000000e+00 : f32
      %c0_59 = arith.constant 0 : index
      %162 = memref.load %arg5[%c0_59] : memref<11xf32, #tpu.memory_space<smem>>
      memref.store %cst_58, %arg5[%c0_59] : memref<11xf32, #tpu.memory_space<smem>>
      %cst_60 = arith.constant 0.000000e+00 : f32
      %c1_61 = arith.constant 1 : index
      %163 = memref.load %arg5[%c1_61] : memref<11xf32, #tpu.memory_space<smem>>
      memref.store %cst_60, %arg5[%c1_61] : memref<11xf32, #tpu.memory_space<smem>>
      %cst_62 = arith.constant 0.000000e+00 : f32
      %c2_63 = arith.constant 2 : index
      %164 = memref.load %arg5[%c2_63] : memref<11xf32, #tpu.memory_space<smem>>
      memref.store %cst_62, %arg5[%c2_63] : memref<11xf32, #tpu.memory_space<smem>>
      %cst_64 = arith.constant 0.000000e+00 : f32
      %c3_65 = arith.constant 3 : index
      %165 = memref.load %arg5[%c3_65] : memref<11xf32, #tpu.memory_space<smem>>
      memref.store %cst_64, %arg5[%c3_65] : memref<11xf32, #tpu.memory_space<smem>>
      %cst_66 = arith.constant 0.000000e+00 : f32
      %c4_67 = arith.constant 4 : index
      %166 = memref.load %arg5[%c4_67] : memref<11xf32, #tpu.memory_space<smem>>
      memref.store %cst_66, %arg5[%c4_67] : memref<11xf32, #tpu.memory_space<smem>>
      %cst_68 = arith.constant 0.000000e+00 : f32
      %c5_69 = arith.constant 5 : index
      %167 = memref.load %arg5[%c5_69] : memref<11xf32, #tpu.memory_space<smem>>
      memref.store %cst_68, %arg5[%c5_69] : memref<11xf32, #tpu.memory_space<smem>>
      %cst_70 = arith.constant 0.000000e+00 : f32
      %c6_71 = arith.constant 6 : index
      %168 = memref.load %arg5[%c6_71] : memref<11xf32, #tpu.memory_space<smem>>
      memref.store %cst_70, %arg5[%c6_71] : memref<11xf32, #tpu.memory_space<smem>>
      %cst_72 = arith.constant 0.000000e+00 : f32
      %c7_73 = arith.constant 7 : index
      %169 = memref.load %arg5[%c7_73] : memref<11xf32, #tpu.memory_space<smem>>
      memref.store %cst_72, %arg5[%c7_73] : memref<11xf32, #tpu.memory_space<smem>>
      %cst_74 = arith.constant 0.000000e+00 : f32
      %c8_75 = arith.constant 8 : index
      %170 = memref.load %arg5[%c8_75] : memref<11xf32, #tpu.memory_space<smem>>
      memref.store %cst_74, %arg5[%c8_75] : memref<11xf32, #tpu.memory_space<smem>>
      %cst_76 = arith.constant 0.000000e+00 : f32
      %c9_77 = arith.constant 9 : index
      %171 = memref.load %arg5[%c9_77] : memref<11xf32, #tpu.memory_space<smem>>
      memref.store %cst_76, %arg5[%c9_77] : memref<11xf32, #tpu.memory_space<smem>>
      %cst_78 = arith.constant 0.000000e+00 : f32
      %c10_79 = arith.constant 10 : index
      %172 = memref.load %arg5[%c10_79] : memref<11xf32, #tpu.memory_space<smem>>
      memref.store %cst_78, %arg5[%c10_79] : memref<11xf32, #tpu.memory_space<smem>>
    } else {
    }
    %c0 = arith.constant 0 : index
    %c0_1 = arith.constant 0 : index
    %3 = vector.load %arg1[%c0, %c0_1] : memref<8x128xf32, #tpu.memory_space<vmem>>, vector<8x128xf32>
    %c0_2 = arith.constant 0 : index
    %c0_3 = arith.constant 0 : index
    %4 = vector.load %arg2[%c0_2, %c0_3] : memref<8x128xf32, #tpu.memory_space<vmem>>, vector<8x128xf32>
    %c0_4 = arith.constant 0 : index
    %c0_5 = arith.constant 0 : index
    %5 = vector.load %arg3[%c0_4, %c0_5] : memref<8x128xf32, #tpu.memory_space<vmem>>, vector<8x128xf32>
    %6 = math.absf %3 : vector<8x128xf32>
    %cst = arith.constant 0.000000e+00 : f32
    %7 = vector.broadcast %cst : f32 to vector<8x128xf32>
    %8 = arith.subf %7, %6 : vector<8x128xf32>
    %9 = math.exp %8 : vector<8x128xf32>
    %cst_6 = arith.constant 1.000000e+00 : f32
    %10 = vector.broadcast %cst_6 : f32 to vector<8x128xf32>
    %11 = arith.addf %10, %9 : vector<8x128xf32>
    %cst_7 = arith.constant 1.000000e+00 : f32
    %12 = vector.broadcast %cst_7 : f32 to vector<8x128xf32>
    %13 = arith.divf %12, %11 : vector<8x128xf32>
    %cst_8 = arith.constant 0.000000e+00 : f32
    %14 = vector.broadcast %cst_8 : f32 to vector<8x128xf32>
    %15 = arith.cmpf oge, %3, %14 : vector<8x128xf32>
    %16 = arith.mulf %9, %13 : vector<8x128xf32>
    %17 = arith.select %15, %13, %16 : vector<8x128xi1>, vector<8x128xf32>
    %18 = arith.subf %17, %4 : vector<8x128xf32>
    %19 = math.absf %18 : vector<8x128xf32>
    %cst_9 = arith.constant 0.000000e+00 : f32
    %20 = vector.broadcast %cst_9 : f32 to vector<8x128xf32>
    %21 = arith.cmpf ogt, %5, %20 : vector<8x128xf32>
    %cst_10 = arith.constant 1.000000e+01 : f32
    %22 = vector.broadcast %cst_10 : f32 to vector<8x128xf32>
    %23 = arith.mulf %19, %22 : vector<8x128xf32>
    %24 = math.floor %23 : vector<8x128xf32>
    %cst_11 = arith.constant 9.000000e+00 : f32
    %25 = vector.broadcast %cst_11 : f32 to vector<8x128xf32>
    %26 = arith.minimumf %24, %25 : vector<8x128xf32>
    %27 = arith.fptosi %26 : vector<8x128xf32> to vector<8x128xi32>
    %c10_i32 = arith.constant 10 : i32
    %28 = vector.broadcast %c10_i32 : i32 to vector<8x128xi32>
    %29 = arith.select %21, %27, %28 : vector<8x128xi1>, vector<8x128xi32>
    %30 = arith.extui %21 : vector<8x128xi1> to vector<8x128xi32>
    %31 = arith.sitofp %30 : vector<8x128xi32> to vector<8x128xf32>
    %c0_12 = arith.constant 0 : index
    %32 = memref.load %arg5[%c0_12] : memref<11xf32, #tpu.memory_space<smem>>
    %c0_i32_13 = arith.constant 0 : i32
    %33 = vector.broadcast %c0_i32_13 : i32 to vector<8x128xi32>
    %34 = arith.cmpi eq, %29, %33 : vector<8x128xi32>
    %cst_14 = arith.constant 1.000000e+00 : f32
    %cst_15 = arith.constant 0.000000e+00 : f32
    %35 = vector.broadcast %cst_14 : f32 to vector<8x128xf32>
    %36 = vector.broadcast %cst_15 : f32 to vector<8x128xf32>
    %37 = arith.select %34, %35, %36 : vector<8x128xi1>, vector<8x128xf32>
    %38 = vector.shape_cast %37 : vector<8x128xf32> to vector<1x8x128xf32>
    %cst_16 = arith.constant dense<0.000000e+00> : vector<1xf32>
    %39 = vector.multi_reduction <add>, %38, %cst_16 [1, 2] : vector<1x8x128xf32> to vector<1xf32>
    %40 = vector.shape_cast %39 : vector<1xf32> to vector<1x1x1xf32>
    %41 = vector.extract %40[0, 0, 0] : f32 from vector<1x1x1xf32>
    %42 = arith.addf %32, %41 : f32
    %c0_17 = arith.constant 0 : index
    %43 = memref.load %arg5[%c0_17] : memref<11xf32, #tpu.memory_space<smem>>
    memref.store %42, %arg5[%c0_17] : memref<11xf32, #tpu.memory_space<smem>>
    %c1 = arith.constant 1 : index
    %44 = memref.load %arg5[%c1] : memref<11xf32, #tpu.memory_space<smem>>
    %c1_i32 = arith.constant 1 : i32
    %45 = vector.broadcast %c1_i32 : i32 to vector<8x128xi32>
    %46 = arith.cmpi eq, %29, %45 : vector<8x128xi32>
    %cst_18 = arith.constant 1.000000e+00 : f32
    %cst_19 = arith.constant 0.000000e+00 : f32
    %47 = vector.broadcast %cst_18 : f32 to vector<8x128xf32>
    %48 = vector.broadcast %cst_19 : f32 to vector<8x128xf32>
    %49 = arith.select %46, %47, %48 : vector<8x128xi1>, vector<8x128xf32>
    %50 = vector.shape_cast %49 : vector<8x128xf32> to vector<1x8x128xf32>
    %cst_20 = arith.constant dense<0.000000e+00> : vector<1xf32>
    %51 = vector.multi_reduction <add>, %50, %cst_20 [1, 2] : vector<1x8x128xf32> to vector<1xf32>
    %52 = vector.shape_cast %51 : vector<1xf32> to vector<1x1x1xf32>
    %53 = vector.extract %52[0, 0, 0] : f32 from vector<1x1x1xf32>
    %54 = arith.addf %44, %53 : f32
    %c1_21 = arith.constant 1 : index
    %55 = memref.load %arg5[%c1_21] : memref<11xf32, #tpu.memory_space<smem>>
    memref.store %54, %arg5[%c1_21] : memref<11xf32, #tpu.memory_space<smem>>
    %c2 = arith.constant 2 : index
    %56 = memref.load %arg5[%c2] : memref<11xf32, #tpu.memory_space<smem>>
    %c2_i32 = arith.constant 2 : i32
    %57 = vector.broadcast %c2_i32 : i32 to vector<8x128xi32>
    %58 = arith.cmpi eq, %29, %57 : vector<8x128xi32>
    %cst_22 = arith.constant 1.000000e+00 : f32
    %cst_23 = arith.constant 0.000000e+00 : f32
    %59 = vector.broadcast %cst_22 : f32 to vector<8x128xf32>
    %60 = vector.broadcast %cst_23 : f32 to vector<8x128xf32>
    %61 = arith.select %58, %59, %60 : vector<8x128xi1>, vector<8x128xf32>
    %62 = vector.shape_cast %61 : vector<8x128xf32> to vector<1x8x128xf32>
    %cst_24 = arith.constant dense<0.000000e+00> : vector<1xf32>
    %63 = vector.multi_reduction <add>, %62, %cst_24 [1, 2] : vector<1x8x128xf32> to vector<1xf32>
    %64 = vector.shape_cast %63 : vector<1xf32> to vector<1x1x1xf32>
    %65 = vector.extract %64[0, 0, 0] : f32 from vector<1x1x1xf32>
    %66 = arith.addf %56, %65 : f32
    %c2_25 = arith.constant 2 : index
    %67 = memref.load %arg5[%c2_25] : memref<11xf32, #tpu.memory_space<smem>>
    memref.store %66, %arg5[%c2_25] : memref<11xf32, #tpu.memory_space<smem>>
    %c3 = arith.constant 3 : index
    %68 = memref.load %arg5[%c3] : memref<11xf32, #tpu.memory_space<smem>>
    %c3_i32 = arith.constant 3 : i32
    %69 = vector.broadcast %c3_i32 : i32 to vector<8x128xi32>
    %70 = arith.cmpi eq, %29, %69 : vector<8x128xi32>
    %cst_26 = arith.constant 1.000000e+00 : f32
    %cst_27 = arith.constant 0.000000e+00 : f32
    %71 = vector.broadcast %cst_26 : f32 to vector<8x128xf32>
    %72 = vector.broadcast %cst_27 : f32 to vector<8x128xf32>
    %73 = arith.select %70, %71, %72 : vector<8x128xi1>, vector<8x128xf32>
    %74 = vector.shape_cast %73 : vector<8x128xf32> to vector<1x8x128xf32>
    %cst_28 = arith.constant dense<0.000000e+00> : vector<1xf32>
    %75 = vector.multi_reduction <add>, %74, %cst_28 [1, 2] : vector<1x8x128xf32> to vector<1xf32>
    %76 = vector.shape_cast %75 : vector<1xf32> to vector<1x1x1xf32>
    %77 = vector.extract %76[0, 0, 0] : f32 from vector<1x1x1xf32>
    %78 = arith.addf %68, %77 : f32
    %c3_29 = arith.constant 3 : index
    %79 = memref.load %arg5[%c3_29] : memref<11xf32, #tpu.memory_space<smem>>
    memref.store %78, %arg5[%c3_29] : memref<11xf32, #tpu.memory_space<smem>>
    %c4 = arith.constant 4 : index
    %80 = memref.load %arg5[%c4] : memref<11xf32, #tpu.memory_space<smem>>
    %c4_i32 = arith.constant 4 : i32
    %81 = vector.broadcast %c4_i32 : i32 to vector<8x128xi32>
    %82 = arith.cmpi eq, %29, %81 : vector<8x128xi32>
    %cst_30 = arith.constant 1.000000e+00 : f32
    %cst_31 = arith.constant 0.000000e+00 : f32
    %83 = vector.broadcast %cst_30 : f32 to vector<8x128xf32>
    %84 = vector.broadcast %cst_31 : f32 to vector<8x128xf32>
    %85 = arith.select %82, %83, %84 : vector<8x128xi1>, vector<8x128xf32>
    %86 = vector.shape_cast %85 : vector<8x128xf32> to vector<1x8x128xf32>
    %cst_32 = arith.constant dense<0.000000e+00> : vector<1xf32>
    %87 = vector.multi_reduction <add>, %86, %cst_32 [1, 2] : vector<1x8x128xf32> to vector<1xf32>
    %88 = vector.shape_cast %87 : vector<1xf32> to vector<1x1x1xf32>
    %89 = vector.extract %88[0, 0, 0] : f32 from vector<1x1x1xf32>
    %90 = arith.addf %80, %89 : f32
    %c4_33 = arith.constant 4 : index
    %91 = memref.load %arg5[%c4_33] : memref<11xf32, #tpu.memory_space<smem>>
    memref.store %90, %arg5[%c4_33] : memref<11xf32, #tpu.memory_space<smem>>
    %c5 = arith.constant 5 : index
    %92 = memref.load %arg5[%c5] : memref<11xf32, #tpu.memory_space<smem>>
    %c5_i32 = arith.constant 5 : i32
    %93 = vector.broadcast %c5_i32 : i32 to vector<8x128xi32>
    %94 = arith.cmpi eq, %29, %93 : vector<8x128xi32>
    %cst_34 = arith.constant 1.000000e+00 : f32
    %cst_35 = arith.constant 0.000000e+00 : f32
    %95 = vector.broadcast %cst_34 : f32 to vector<8x128xf32>
    %96 = vector.broadcast %cst_35 : f32 to vector<8x128xf32>
    %97 = arith.select %94, %95, %96 : vector<8x128xi1>, vector<8x128xf32>
    %98 = vector.shape_cast %97 : vector<8x128xf32> to vector<1x8x128xf32>
    %cst_36 = arith.constant dense<0.000000e+00> : vector<1xf32>
    %99 = vector.multi_reduction <add>, %98, %cst_36 [1, 2] : vector<1x8x128xf32> to vector<1xf32>
    %100 = vector.shape_cast %99 : vector<1xf32> to vector<1x1x1xf32>
    %101 = vector.extract %100[0, 0, 0] : f32 from vector<1x1x1xf32>
    %102 = arith.addf %92, %101 : f32
    %c5_37 = arith.constant 5 : index
    %103 = memref.load %arg5[%c5_37] : memref<11xf32, #tpu.memory_space<smem>>
    memref.store %102, %arg5[%c5_37] : memref<11xf32, #tpu.memory_space<smem>>
    %c6 = arith.constant 6 : index
    %104 = memref.load %arg5[%c6] : memref<11xf32, #tpu.memory_space<smem>>
    %c6_i32 = arith.constant 6 : i32
    %105 = vector.broadcast %c6_i32 : i32 to vector<8x128xi32>
    %106 = arith.cmpi eq, %29, %105 : vector<8x128xi32>
    %cst_38 = arith.constant 1.000000e+00 : f32
    %cst_39 = arith.constant 0.000000e+00 : f32
    %107 = vector.broadcast %cst_38 : f32 to vector<8x128xf32>
    %108 = vector.broadcast %cst_39 : f32 to vector<8x128xf32>
    %109 = arith.select %106, %107, %108 : vector<8x128xi1>, vector<8x128xf32>
    %110 = vector.shape_cast %109 : vector<8x128xf32> to vector<1x8x128xf32>
    %cst_40 = arith.constant dense<0.000000e+00> : vector<1xf32>
    %111 = vector.multi_reduction <add>, %110, %cst_40 [1, 2] : vector<1x8x128xf32> to vector<1xf32>
    %112 = vector.shape_cast %111 : vector<1xf32> to vector<1x1x1xf32>
    %113 = vector.extract %112[0, 0, 0] : f32 from vector<1x1x1xf32>
    %114 = arith.addf %104, %113 : f32
    %c6_41 = arith.constant 6 : index
    %115 = memref.load %arg5[%c6_41] : memref<11xf32, #tpu.memory_space<smem>>
    memref.store %114, %arg5[%c6_41] : memref<11xf32, #tpu.memory_space<smem>>
    %c7 = arith.constant 7 : index
    %116 = memref.load %arg5[%c7] : memref<11xf32, #tpu.memory_space<smem>>
    %c7_i32 = arith.constant 7 : i32
    %117 = vector.broadcast %c7_i32 : i32 to vector<8x128xi32>
    %118 = arith.cmpi eq, %29, %117 : vector<8x128xi32>
    %cst_42 = arith.constant 1.000000e+00 : f32
    %cst_43 = arith.constant 0.000000e+00 : f32
    %119 = vector.broadcast %cst_42 : f32 to vector<8x128xf32>
    %120 = vector.broadcast %cst_43 : f32 to vector<8x128xf32>
    %121 = arith.select %118, %119, %120 : vector<8x128xi1>, vector<8x128xf32>
    %122 = vector.shape_cast %121 : vector<8x128xf32> to vector<1x8x128xf32>
    %cst_44 = arith.constant dense<0.000000e+00> : vector<1xf32>
    %123 = vector.multi_reduction <add>, %122, %cst_44 [1, 2] : vector<1x8x128xf32> to vector<1xf32>
    %124 = vector.shape_cast %123 : vector<1xf32> to vector<1x1x1xf32>
    %125 = vector.extract %124[0, 0, 0] : f32 from vector<1x1x1xf32>
    %126 = arith.addf %116, %125 : f32
    %c7_45 = arith.constant 7 : index
    %127 = memref.load %arg5[%c7_45] : memref<11xf32, #tpu.memory_space<smem>>
    memref.store %126, %arg5[%c7_45] : memref<11xf32, #tpu.memory_space<smem>>
    %c8 = arith.constant 8 : index
    %128 = memref.load %arg5[%c8] : memref<11xf32, #tpu.memory_space<smem>>
    %c8_i32 = arith.constant 8 : i32
    %129 = vector.broadcast %c8_i32 : i32 to vector<8x128xi32>
    %130 = arith.cmpi eq, %29, %129 : vector<8x128xi32>
    %cst_46 = arith.constant 1.000000e+00 : f32
    %cst_47 = arith.constant 0.000000e+00 : f32
    %131 = vector.broadcast %cst_46 : f32 to vector<8x128xf32>
    %132 = vector.broadcast %cst_47 : f32 to vector<8x128xf32>
    %133 = arith.select %130, %131, %132 : vector<8x128xi1>, vector<8x128xf32>
    %134 = vector.shape_cast %133 : vector<8x128xf32> to vector<1x8x128xf32>
    %cst_48 = arith.constant dense<0.000000e+00> : vector<1xf32>
    %135 = vector.multi_reduction <add>, %134, %cst_48 [1, 2] : vector<1x8x128xf32> to vector<1xf32>
    %136 = vector.shape_cast %135 : vector<1xf32> to vector<1x1x1xf32>
    %137 = vector.extract %136[0, 0, 0] : f32 from vector<1x1x1xf32>
    %138 = arith.addf %128, %137 : f32
    %c8_49 = arith.constant 8 : index
    %139 = memref.load %arg5[%c8_49] : memref<11xf32, #tpu.memory_space<smem>>
    memref.store %138, %arg5[%c8_49] : memref<11xf32, #tpu.memory_space<smem>>
    %c9 = arith.constant 9 : index
    %140 = memref.load %arg5[%c9] : memref<11xf32, #tpu.memory_space<smem>>
    %c9_i32 = arith.constant 9 : i32
    %141 = vector.broadcast %c9_i32 : i32 to vector<8x128xi32>
    %142 = arith.cmpi eq, %29, %141 : vector<8x128xi32>
    %cst_50 = arith.constant 1.000000e+00 : f32
    %cst_51 = arith.constant 0.000000e+00 : f32
    %143 = vector.broadcast %cst_50 : f32 to vector<8x128xf32>
    %144 = vector.broadcast %cst_51 : f32 to vector<8x128xf32>
    %145 = arith.select %142, %143, %144 : vector<8x128xi1>, vector<8x128xf32>
    %146 = vector.shape_cast %145 : vector<8x128xf32> to vector<1x8x128xf32>
    %cst_52 = arith.constant dense<0.000000e+00> : vector<1xf32>
    %147 = vector.multi_reduction <add>, %146, %cst_52 [1, 2] : vector<1x8x128xf32> to vector<1xf32>
    %148 = vector.shape_cast %147 : vector<1xf32> to vector<1x1x1xf32>
    %149 = vector.extract %148[0, 0, 0] : f32 from vector<1x1x1xf32>
    %150 = arith.addf %140, %149 : f32
    %c9_53 = arith.constant 9 : index
    %151 = memref.load %arg5[%c9_53] : memref<11xf32, #tpu.memory_space<smem>>
    memref.store %150, %arg5[%c9_53] : memref<11xf32, #tpu.memory_space<smem>>
    %c10 = arith.constant 10 : index
    %152 = memref.load %arg5[%c10] : memref<11xf32, #tpu.memory_space<smem>>
    %153 = vector.shape_cast %31 : vector<8x128xf32> to vector<1x8x128xf32>
    %cst_54 = arith.constant dense<0.000000e+00> : vector<1xf32>
    %154 = vector.multi_reduction <add>, %153, %cst_54 [1, 2] : vector<1x8x128xf32> to vector<1xf32>
    %155 = vector.shape_cast %154 : vector<1xf32> to vector<1x1x1xf32>
    %156 = vector.extract %155[0, 0, 0] : f32 from vector<1x1x1xf32>
    %157 = arith.addf %152, %156 : f32
    %c10_55 = arith.constant 10 : index
    %158 = memref.load %arg5[%c10_55] : memref<11xf32, #tpu.memory_space<smem>>
    memref.store %157, %arg5[%c10_55] : memref<11xf32, #tpu.memory_space<smem>>
    %c0_i32_56 = arith.constant 0 : i32
    %159 = arith.cmpi eq, %arg0, %c0_i32_56 : i32
    %160 = arith.extui %159 : i1 to i32
    %c0_i32_57 = arith.constant 0 : i32
    %161 = arith.cmpi ne, %160, %c0_i32_57 : i32
    scf.if %161 {
      %c10_58 = arith.constant 10 : index
      %162 = memref.load %arg5[%c10_58] : memref<11xf32, #tpu.memory_space<smem>>
      %cst_59 = arith.constant 1.000000e+00 : f32
      %163 = arith.maximumf %162, %cst_59 : f32
      %c0_60 = arith.constant 0 : index
      %164 = memref.load %arg5[%c0_60] : memref<11xf32, #tpu.memory_space<smem>>
      %cst_61 = arith.constant 0.000000e+00 : f32
      %165 = arith.cmpf ogt, %164, %cst_61 : f32
      %cst_62 = arith.constant 1.000000e+00 : f32
      %cst_63 = arith.constant 0.000000e+00 : f32
      %166 = arith.select %165, %cst_62, %cst_63 : f32
      %cst_64 = arith.constant 0.000000e+00 : f32
      %167 = arith.addf %cst_64, %166 : f32
      %c1_65 = arith.constant 1 : index
      %168 = memref.load %arg5[%c1_65] : memref<11xf32, #tpu.memory_space<smem>>
      %cst_66 = arith.constant 0.000000e+00 : f32
      %169 = arith.cmpf ogt, %168, %cst_66 : f32
      %cst_67 = arith.constant 1.000000e+00 : f32
      %cst_68 = arith.constant 0.000000e+00 : f32
      %170 = arith.select %169, %cst_67, %cst_68 : f32
      %171 = arith.addf %167, %170 : f32
      %c2_69 = arith.constant 2 : index
      %172 = memref.load %arg5[%c2_69] : memref<11xf32, #tpu.memory_space<smem>>
      %cst_70 = arith.constant 0.000000e+00 : f32
      %173 = arith.cmpf ogt, %172, %cst_70 : f32
      %cst_71 = arith.constant 1.000000e+00 : f32
      %cst_72 = arith.constant 0.000000e+00 : f32
      %174 = arith.select %173, %cst_71, %cst_72 : f32
      %175 = arith.addf %171, %174 : f32
      %c3_73 = arith.constant 3 : index
      %176 = memref.load %arg5[%c3_73] : memref<11xf32, #tpu.memory_space<smem>>
      %cst_74 = arith.constant 0.000000e+00 : f32
      %177 = arith.cmpf ogt, %176, %cst_74 : f32
      %cst_75 = arith.constant 1.000000e+00 : f32
      %cst_76 = arith.constant 0.000000e+00 : f32
      %178 = arith.select %177, %cst_75, %cst_76 : f32
      %179 = arith.addf %175, %178 : f32
      %c4_77 = arith.constant 4 : index
      %180 = memref.load %arg5[%c4_77] : memref<11xf32, #tpu.memory_space<smem>>
      %cst_78 = arith.constant 0.000000e+00 : f32
      %181 = arith.cmpf ogt, %180, %cst_78 : f32
      %cst_79 = arith.constant 1.000000e+00 : f32
      %cst_80 = arith.constant 0.000000e+00 : f32
      %182 = arith.select %181, %cst_79, %cst_80 : f32
      %183 = arith.addf %179, %182 : f32
      %c5_81 = arith.constant 5 : index
      %184 = memref.load %arg5[%c5_81] : memref<11xf32, #tpu.memory_space<smem>>
      %cst_82 = arith.constant 0.000000e+00 : f32
      %185 = arith.cmpf ogt, %184, %cst_82 : f32
      %cst_83 = arith.constant 1.000000e+00 : f32
      %cst_84 = arith.constant 0.000000e+00 : f32
      %186 = arith.select %185, %cst_83, %cst_84 : f32
      %187 = arith.addf %183, %186 : f32
      %c6_85 = arith.constant 6 : index
      %188 = memref.load %arg5[%c6_85] : memref<11xf32, #tpu.memory_space<smem>>
      %cst_86 = arith.constant 0.000000e+00 : f32
      %189 = arith.cmpf ogt, %188, %cst_86 : f32
      %cst_87 = arith.constant 1.000000e+00 : f32
      %cst_88 = arith.constant 0.000000e+00 : f32
      %190 = arith.select %189, %cst_87, %cst_88 : f32
      %191 = arith.addf %187, %190 : f32
      %c7_89 = arith.constant 7 : index
      %192 = memref.load %arg5[%c7_89] : memref<11xf32, #tpu.memory_space<smem>>
      %cst_90 = arith.constant 0.000000e+00 : f32
      %193 = arith.cmpf ogt, %192, %cst_90 : f32
      %cst_91 = arith.constant 1.000000e+00 : f32
      %cst_92 = arith.constant 0.000000e+00 : f32
      %194 = arith.select %193, %cst_91, %cst_92 : f32
      %195 = arith.addf %191, %194 : f32
      %c8_93 = arith.constant 8 : index
      %196 = memref.load %arg5[%c8_93] : memref<11xf32, #tpu.memory_space<smem>>
      %cst_94 = arith.constant 0.000000e+00 : f32
      %197 = arith.cmpf ogt, %196, %cst_94 : f32
      %cst_95 = arith.constant 1.000000e+00 : f32
      %cst_96 = arith.constant 0.000000e+00 : f32
      %198 = arith.select %197, %cst_95, %cst_96 : f32
      %199 = arith.addf %195, %198 : f32
      %c9_97 = arith.constant 9 : index
      %200 = memref.load %arg5[%c9_97] : memref<11xf32, #tpu.memory_space<smem>>
      %cst_98 = arith.constant 0.000000e+00 : f32
      %201 = arith.cmpf ogt, %200, %cst_98 : f32
      %cst_99 = arith.constant 1.000000e+00 : f32
      %cst_100 = arith.constant 0.000000e+00 : f32
      %202 = arith.select %201, %cst_99, %cst_100 : f32
      %203 = arith.addf %199, %202 : f32
      %cst_101 = arith.constant 1.000000e+00 : f32
      %204 = arith.maximumf %203, %cst_101 : f32
      %205 = tpu.iota {dimensions = array<i32: 1>} : vector<1x128xi32>
      %cst_102 = arith.constant 0.000000e+00 : f32
      %206 = vector.broadcast %cst_102 : f32 to vector<1x128xf32>
      %c0_103 = arith.constant 0 : index
      %207 = memref.load %arg5[%c0_103] : memref<11xf32, #tpu.memory_space<smem>>
      %cst_104 = arith.constant 0.000000e+00 : f32
      %208 = arith.cmpf ogt, %207, %cst_104 : f32
      %cst_105 = arith.constant 1.000000e+00 : f32
      %209 = arith.maximumf %207, %cst_105 : f32
      %210 = arith.mulf %209, %204 : f32
      %211 = arith.divf %163, %210 : f32
      %cst_106 = arith.constant 0.000000e+00 : f32
      %212 = arith.select %208, %211, %cst_106 : f32
      %c0_i32_107 = arith.constant 0 : i32
      %213 = vector.broadcast %c0_i32_107 : i32 to vector<1x128xi32>
      %214 = arith.cmpi eq, %205, %213 : vector<1x128xi32>
      %215 = vector.broadcast %212 : f32 to vector<1x128xf32>
      %216 = arith.select %214, %215, %206 : vector<1x128xi1>, vector<1x128xf32>
      %c1_108 = arith.constant 1 : index
      %217 = memref.load %arg5[%c1_108] : memref<11xf32, #tpu.memory_space<smem>>
      %cst_109 = arith.constant 0.000000e+00 : f32
      %218 = arith.cmpf ogt, %217, %cst_109 : f32
      %cst_110 = arith.constant 1.000000e+00 : f32
      %219 = arith.maximumf %217, %cst_110 : f32
      %220 = arith.mulf %219, %204 : f32
      %221 = arith.divf %163, %220 : f32
      %cst_111 = arith.constant 0.000000e+00 : f32
      %222 = arith.select %218, %221, %cst_111 : f32
      %c1_i32_112 = arith.constant 1 : i32
      %223 = vector.broadcast %c1_i32_112 : i32 to vector<1x128xi32>
      %224 = arith.cmpi eq, %205, %223 : vector<1x128xi32>
      %225 = vector.broadcast %222 : f32 to vector<1x128xf32>
      %226 = arith.select %224, %225, %216 : vector<1x128xi1>, vector<1x128xf32>
      %c2_113 = arith.constant 2 : index
      %227 = memref.load %arg5[%c2_113] : memref<11xf32, #tpu.memory_space<smem>>
      %cst_114 = arith.constant 0.000000e+00 : f32
      %228 = arith.cmpf ogt, %227, %cst_114 : f32
      %cst_115 = arith.constant 1.000000e+00 : f32
      %229 = arith.maximumf %227, %cst_115 : f32
      %230 = arith.mulf %229, %204 : f32
      %231 = arith.divf %163, %230 : f32
      %cst_116 = arith.constant 0.000000e+00 : f32
      %232 = arith.select %228, %231, %cst_116 : f32
      %c2_i32_117 = arith.constant 2 : i32
      %233 = vector.broadcast %c2_i32_117 : i32 to vector<1x128xi32>
      %234 = arith.cmpi eq, %205, %233 : vector<1x128xi32>
      %235 = vector.broadcast %232 : f32 to vector<1x128xf32>
      %236 = arith.select %234, %235, %226 : vector<1x128xi1>, vector<1x128xf32>
      %c3_118 = arith.constant 3 : index
      %237 = memref.load %arg5[%c3_118] : memref<11xf32, #tpu.memory_space<smem>>
      %cst_119 = arith.constant 0.000000e+00 : f32
      %238 = arith.cmpf ogt, %237, %cst_119 : f32
      %cst_120 = arith.constant 1.000000e+00 : f32
      %239 = arith.maximumf %237, %cst_120 : f32
      %240 = arith.mulf %239, %204 : f32
      %241 = arith.divf %163, %240 : f32
      %cst_121 = arith.constant 0.000000e+00 : f32
      %242 = arith.select %238, %241, %cst_121 : f32
      %c3_i32_122 = arith.constant 3 : i32
      %243 = vector.broadcast %c3_i32_122 : i32 to vector<1x128xi32>
      %244 = arith.cmpi eq, %205, %243 : vector<1x128xi32>
      %245 = vector.broadcast %242 : f32 to vector<1x128xf32>
      %246 = arith.select %244, %245, %236 : vector<1x128xi1>, vector<1x128xf32>
      %c4_123 = arith.constant 4 : index
      %247 = memref.load %arg5[%c4_123] : memref<11xf32, #tpu.memory_space<smem>>
      %cst_124 = arith.constant 0.000000e+00 : f32
      %248 = arith.cmpf ogt, %247, %cst_124 : f32
      %cst_125 = arith.constant 1.000000e+00 : f32
      %249 = arith.maximumf %247, %cst_125 : f32
      %250 = arith.mulf %249, %204 : f32
      %251 = arith.divf %163, %250 : f32
      %cst_126 = arith.constant 0.000000e+00 : f32
      %252 = arith.select %248, %251, %cst_126 : f32
      %c4_i32_127 = arith.constant 4 : i32
      %253 = vector.broadcast %c4_i32_127 : i32 to vector<1x128xi32>
      %254 = arith.cmpi eq, %205, %253 : vector<1x128xi32>
      %255 = vector.broadcast %252 : f32 to vector<1x128xf32>
      %256 = arith.select %254, %255, %246 : vector<1x128xi1>, vector<1x128xf32>
      %c5_128 = arith.constant 5 : index
      %257 = memref.load %arg5[%c5_128] : memref<11xf32, #tpu.memory_space<smem>>
      %cst_129 = arith.constant 0.000000e+00 : f32
      %258 = arith.cmpf ogt, %257, %cst_129 : f32
      %cst_130 = arith.constant 1.000000e+00 : f32
      %259 = arith.maximumf %257, %cst_130 : f32
      %260 = arith.mulf %259, %204 : f32
      %261 = arith.divf %163, %260 : f32
      %cst_131 = arith.constant 0.000000e+00 : f32
      %262 = arith.select %258, %261, %cst_131 : f32
      %c5_i32_132 = arith.constant 5 : i32
      %263 = vector.broadcast %c5_i32_132 : i32 to vector<1x128xi32>
      %264 = arith.cmpi eq, %205, %263 : vector<1x128xi32>
      %265 = vector.broadcast %262 : f32 to vector<1x128xf32>
      %266 = arith.select %264, %265, %256 : vector<1x128xi1>, vector<1x128xf32>
      %c6_133 = arith.constant 6 : index
      %267 = memref.load %arg5[%c6_133] : memref<11xf32, #tpu.memory_space<smem>>
      %cst_134 = arith.constant 0.000000e+00 : f32
      %268 = arith.cmpf ogt, %267, %cst_134 : f32
      %cst_135 = arith.constant 1.000000e+00 : f32
      %269 = arith.maximumf %267, %cst_135 : f32
      %270 = arith.mulf %269, %204 : f32
      %271 = arith.divf %163, %270 : f32
      %cst_136 = arith.constant 0.000000e+00 : f32
      %272 = arith.select %268, %271, %cst_136 : f32
      %c6_i32_137 = arith.constant 6 : i32
      %273 = vector.broadcast %c6_i32_137 : i32 to vector<1x128xi32>
      %274 = arith.cmpi eq, %205, %273 : vector<1x128xi32>
      %275 = vector.broadcast %272 : f32 to vector<1x128xf32>
      %276 = arith.select %274, %275, %266 : vector<1x128xi1>, vector<1x128xf32>
      %c7_138 = arith.constant 7 : index
      %277 = memref.load %arg5[%c7_138] : memref<11xf32, #tpu.memory_space<smem>>
      %cst_139 = arith.constant 0.000000e+00 : f32
      %278 = arith.cmpf ogt, %277, %cst_139 : f32
      %cst_140 = arith.constant 1.000000e+00 : f32
      %279 = arith.maximumf %277, %cst_140 : f32
      %280 = arith.mulf %279, %204 : f32
      %281 = arith.divf %163, %280 : f32
      %cst_141 = arith.constant 0.000000e+00 : f32
      %282 = arith.select %278, %281, %cst_141 : f32
      %c7_i32_142 = arith.constant 7 : i32
      %283 = vector.broadcast %c7_i32_142 : i32 to vector<1x128xi32>
      %284 = arith.cmpi eq, %205, %283 : vector<1x128xi32>
      %285 = vector.broadcast %282 : f32 to vector<1x128xf32>
      %286 = arith.select %284, %285, %276 : vector<1x128xi1>, vector<1x128xf32>
      %c8_143 = arith.constant 8 : index
      %287 = memref.load %arg5[%c8_143] : memref<11xf32, #tpu.memory_space<smem>>
      %cst_144 = arith.constant 0.000000e+00 : f32
      %288 = arith.cmpf ogt, %287, %cst_144 : f32
      %cst_145 = arith.constant 1.000000e+00 : f32
      %289 = arith.maximumf %287, %cst_145 : f32
      %290 = arith.mulf %289, %204 : f32
      %291 = arith.divf %163, %290 : f32
      %cst_146 = arith.constant 0.000000e+00 : f32
      %292 = arith.select %288, %291, %cst_146 : f32
      %c8_i32_147 = arith.constant 8 : i32
      %293 = vector.broadcast %c8_i32_147 : i32 to vector<1x128xi32>
      %294 = arith.cmpi eq, %205, %293 : vector<1x128xi32>
      %295 = vector.broadcast %292 : f32 to vector<1x128xf32>
      %296 = arith.select %294, %295, %286 : vector<1x128xi1>, vector<1x128xf32>
      %c9_148 = arith.constant 9 : index
      %297 = memref.load %arg5[%c9_148] : memref<11xf32, #tpu.memory_space<smem>>
      %cst_149 = arith.constant 0.000000e+00 : f32
      %298 = arith.cmpf ogt, %297, %cst_149 : f32
      %cst_150 = arith.constant 1.000000e+00 : f32
      %299 = arith.maximumf %297, %cst_150 : f32
      %300 = arith.mulf %299, %204 : f32
      %301 = arith.divf %163, %300 : f32
      %cst_151 = arith.constant 0.000000e+00 : f32
      %302 = arith.select %298, %301, %cst_151 : f32
      %c9_i32_152 = arith.constant 9 : i32
      %303 = vector.broadcast %c9_i32_152 : i32 to vector<1x128xi32>
      %304 = arith.cmpi eq, %205, %303 : vector<1x128xi32>
      %305 = vector.broadcast %302 : f32 to vector<1x128xf32>
      %306 = arith.select %304, %305, %296 : vector<1x128xi1>, vector<1x128xf32>
      %c0_153 = arith.constant 0 : index
      %c0_154 = arith.constant 0 : index
      %307 = vector.load %arg4[%c0_153, %c0_154] : memref<1x128xf32, #tpu.memory_space<vmem>>, vector<1x128xf32>
      tpu.vector_store %arg4[%c0_153, %c0_154], %306 {strides = array<i32>} : memref<1x128xf32, #tpu.memory_space<vmem>>, vector<1x128xf32>,
    } else {
    }
    return
  }
  func.func @transform_0(%arg0: i32) -> (i32, i32) {
    %c0_i32 = arith.constant 0 : i32
    %c0_i32_0 = arith.constant 0 : i32
    return %arg0, %c0_i32 : i32, i32
  }
  func.func @transform_1(%arg0: i32) -> (i32, i32) {
    %c0_i32 = arith.constant 0 : i32
    %c0_i32_0 = arith.constant 0 : i32
    return %arg0, %c0_i32 : i32, i32
  }
  func.func @transform_2(%arg0: i32) -> (i32, i32) {
    %c0_i32 = arith.constant 0 : i32
    %c0_i32_0 = arith.constant 0 : i32
    return %arg0, %c0_i32 : i32, i32
  }
  func.func @transform_3(%arg0: i32) -> (i32, i32) {
    %c0_i32 = arith.constant 0 : i32
    %c0_i32_0 = arith.constant 0 : i32
    %c0_i32_1 = arith.constant 0 : i32
    return %c0_i32, %c0_i32_0 : i32, i32
  }
}

</mosaic_0001>

<bundles_post_ra>
// kernel: tpu_custom_call.1
= control target key start
LH: loop header
LB: loop body
LE: loop exit
PB: predicated region body
PF: predicated region fallthrough
CT: control target
= control target key end

     0   :  { %8 = vsyncpa [#allocation4], 0  ;;  %s820_s0 = inlined_call_operand.hbm [shape: f32[8,128], index: 0, kind: input, shape index: {}]   ;;  %s821_s1 = inlined_call_operand.hbm [shape: f32[8,128], index: 1, kind: input, shape index: {}]   ;;  %s822_s2 = inlined_call_operand.hbm [shape: f32[8,128], index: 2, kind: input, shape index: {}]   ;;  %s823_s3 = inlined_call_operand.hbm [shape: f32[1,128], index: 3, kind: output, shape index: {}]  }
   0x1   :  { %9 = vsyncpa [#allocation7], 0 }
   0x2   :  { %10 = vsyncpa [#allocation5], 0  ;;  %s616_s12 = smov [#allocation6]   ;;  %s617_s14 = smov [#allocation3]  }
   0x3   :  { %s27_s13 = sshll.u32 %s616_s12, 4  ;;  %s17_s15 = sshll.u32 %s617_s14, 4  ;;  %s28_s13 = int_to_ptr.vmem [resolvable:$true] %s27_s13  ;;  %s18_s15 = int_to_ptr.vmem [resolvable:$true] %s17_s15 }
   0x4   :  { %s522_s18 = scalar_lea.hbm %s821_s1, 128 }
   0x5   :  { %p523_p0 = scmp.ne.s32.totalorder %s821_s1, %s522_s18  ;;  %p526_p1 = scmp.lt.u32.totalorder %s522_s18, %s821_s1 }
   0x7   :  { %p528_p2 = pnand %p526_p1, %p523_p0 }
   0x9   :  { %531 = shalt.err (!%p528_p2)
}
   0xa   :  { %s532_s23 = scalar_lea.vmem %s28_s13, 128  ;;  %p537_p4 = scmp.lt.s32.totalorder %s28_s13, %s28_s13 }
   0xb   :  { %p533_p3 = scmp.ne.s32.totalorder %s28_s13, %s532_s23  ;;  %p538_p5 = scmp.lt.s32.totalorder %s532_s23, %s532_s23 }
   0xd   :  { %p539_p6 = por %p538_p5, %p537_p4 }
   0xf   :  { %p540_p7 = pnand %p539_p6, %p533_p3 }
  0x11   :  { %543 = shalt.err (!%p540_p7)
}
  0x12   :  { %30 = dma.hbm_to_vmem [thread:$0]  %s821_s1, 128, %s28_s13, [#allocation7]  }
  0x13   :  { %s544_s28 = scalar_lea.hbm %s820_s0, 128 }
  0x14   :  { %p545_p8 = scmp.ne.s32.totalorder %s820_s0, %s544_s28  ;;  %p548_p9 = scmp.lt.u32.totalorder %s544_s28, %s820_s0 }
  0x16   :  { %p550_p10 = pnand %p548_p9, %p545_p8 }
  0x18   :  { %553 = shalt.err (!%p550_p10)
}
  0x19   :  { %s554_s6 = scalar_lea.vmem %s18_s15, 128  ;;  %p559_p12 = scmp.lt.s32.totalorder %s18_s15, %s18_s15 }
  0x1a   :  { %p555_p11 = scmp.ne.s32.totalorder %s18_s15, %s554_s6  ;;  %p560_p13 = scmp.lt.s32.totalorder %s554_s6, %s554_s6 }
  0x1c   :  { %p561_p0 = por %p560_p13, %p559_p12 }
  0x1e   :  { %p562_p1 = pnand %p561_p0, %p555_p11 }
  0x20   :  { %565 = shalt.err (!%p562_p1)
}
  0x21   :  { %20 = dma.hbm_to_vmem [thread:$0]  %s820_s0, 128, %s18_s15, [#allocation4]  }
  0x22   :  { %s618_s8 = smov [#allocation8]   ;;  %s566_s12 = scalar_lea.hbm %s822_s2, 128 }
  0x23   :  { %s37_s9 = sshll.u32 %s618_s8, 4  ;;  %p567_p2 = scmp.ne.s32.totalorder %s822_s2, %s566_s12  ;;  %s38_s9 = int_to_ptr.vmem [resolvable:$true] %s37_s9 }
  0x24   :  { %p570_p3 = scmp.lt.u32.totalorder %s566_s12, %s822_s2 }
  0x26   :  { %p572_p4 = pnand %p570_p3, %p567_p2 }
  0x28   :  { %575 = shalt.err (!%p572_p4)
}
  0x29   :  { %s576_s18 = scalar_lea.vmem %s38_s9, 128  ;;  %p581_p6 = scmp.lt.s32.totalorder %s38_s9, %s38_s9 }
  0x2a   :  { %p577_p5 = scmp.ne.s32.totalorder %s38_s9, %s576_s18  ;;  %p582_p7 = scmp.lt.s32.totalorder %s576_s18, %s576_s18 }
  0x2c   :  { %p583_p8 = por %p582_p7, %p581_p6 }
  0x2e   :  { %p584_p9 = pnand %p583_p8, %p577_p5 }
  0x30   :  { %587 = shalt.err (!%p584_p9)
}
  0x31   :  { %40 = dma.hbm_to_vmem [thread:$0]  %s822_s2, 128, %s38_s9, [#allocation7]  }
  0x32   :  { %610 = dma.done.wait [#allocation4], 128  }
  0x33   :  { %611 = vsyncadd [#allocation4], 4294967168 }
  0x34   :  { %612 = dma.done.wait [#allocation7], 256  }
  0x35   :  { %613 = vsyncadd [#allocation7], 4294967040  ;;  %v76_v0 = vld [vmem:[#allocation3] sm:$0xff]  ;;  %v77_v7 = vld [vmem:[#allocation6] sm:$0xff]  ;;  %v619_v19 = vmov 0.0   ;;  %s620_s15 = smov 1.0  }
  0x36   :  { %v79_v1 = vand.u32 2147483647, %v76_v0  ;;  %vm86_vm0 = vcmp.ge.f32.partialorder %v76_v0, 0.0  ;;  %v78_v14 = vld [vmem:[#allocation8] sm:$0xff] }
  0x37   :  { %vm91_vm1 = vcmp.gt.f32.partialorder %v78_v14, 0.0 }
  0x38   :  { %v80_v2 = vsub.f32 0.0, %v79_v1  ;;  %v427_v30 = vsel %vm91_vm1, 1.0, %v619_v19 }
  0x3a   :  { %v81_v3 = vmul.f32 1.442695, %v80_v2 }
  0x3c   :  { %498 = vpow2.f32 %v81_v3 }
  0x46   :  { %v499_v4 = vpop.eup %498 }
  0x47   :  { %v83_v5 = vadd.f32 1.0, %v499_v4 }
  0x49   :  { %500 = vrcp.f32 %v83_v5 }
  0x53   :  { %v501_v6 = vpop.eup %500 }
  0x54   :  { %v87_v8 = vmul.f32 %v501_v6, %v499_v4 }
  0x56   :  { %v88_v9 = vsel %vm86_vm0, %v501_v6, %v87_v8 }
  0x57   :  { %v89_v10 = vsub.f32 %v88_v9, %v77_v7 }
  0x59   :  { %v90_v11 = vand.u32 2147483647, %v89_v10 }
  0x5b   :  { %v92_v12 = vmul.f32 10.0, %v90_v11 }
  0x5d   :  { %v93_v13 = vfloor.f32 %v92_v12 }
  0x5f   :  { %v94_v15 = vmin.f32 %v93_v13, 9.0 }
  0x61   :  { %v448_v16 = vtrunc.f32 %v94_v15 }
  0x63   :  { %v449_v17 = vcvt.f32.s32 %v448_v16 }
  0x65   :  { %v96_v18 = vsel %vm91_vm1, %v449_v17, 10 }
  0x66   :  { %vm130_vm2 = vcmp.eq.s32.totalorder %v96_v18, 2  ;;  %vm100_vm3 = vcmp.eq.s32.totalorder %v96_v18, 0  ;;  %vm145_vm4 = vcmp.eq.s32.totalorder %v96_v18, 3  ;;  %vm115_vm5 = vcmp.eq.s32.totalorder %v96_v18, 1 }
  0x67   :  { %v131_v20 = vsel %vm130_vm2, 1.0, %v619_v19  ;;  %v101_v21 = vsel %vm100_vm3, 1.0, %v619_v19  ;;  %v146_v22 = vsel %vm145_vm4, 1.0, %v619_v19  ;;  %v116_v23 = vsel %vm115_vm5, 1.0, %v619_v19 }
  0x68   :  { %132 = vadd.xlane.f32.xlu1 %v131_v20  ;;  %102 = vadd.xlane.f32.xlu0 %v101_v21  ;;  %vm175_vm6 = vcmp.eq.s32.totalorder %v96_v18, 5  ;;  %vm160_vm7 = vcmp.eq.s32.totalorder %v96_v18, 4  ;;  %vm205_vm8 = vcmp.eq.s32.totalorder %v96_v18, 7  ;;  %vm190_vm9 = vcmp.eq.s32.totalorder %v96_v18, 6 }
  0x69   :  { %v176_v24 = vsel %vm175_vm6, 1.0, %v619_v19  ;;  %v161_v25 = vsel %vm160_vm7, 1.0, %v619_v19  ;;  %v206_v26 = vsel %vm205_vm8, 1.0, %v619_v19  ;;  %v191_v27 = vsel %vm190_vm9, 1.0, %v619_v19 }
  0x6a   :  { %vm235_vm10 = vcmp.eq.s32.totalorder %v96_v18, 9  ;;  %vm220_vm11 = vcmp.eq.s32.totalorder %v96_v18, 8 }
  0x6b   :  { %v236_v28 = vsel %vm235_vm10, 1.0, %v619_v19  ;;  %v221_v29 = vsel %vm220_vm11, 1.0, %v619_v19 }
  0x6c   :  { %147 = vadd.xlane.f32.xlu1 %v146_v22  ;;  %117 = vadd.xlane.f32.xlu0 %v116_v23 }
  0x70   :  { %177 = vadd.xlane.f32.xlu1 %v176_v24  ;;  %162 = vadd.xlane.f32.xlu0 %v161_v25 }
  0x74   :  { %207 = vadd.xlane.f32.xlu1 %v206_v26  ;;  %192 = vadd.xlane.f32.xlu0 %v191_v27 }
  0x78   :  { %237 = vadd.xlane.f32.xlu1 %v236_v28  ;;  %222 = vadd.xlane.f32.xlu0 %v221_v29 }
  0x7c   :  { %250 = vadd.xlane.f32.xlu0 %v427_v30 }
  0xf5   :  { %v133_v31 = vpop.xlane.xlu1 %132  ;;  %v103_v32 = vpop.xlane.xlu0 %102 }
  0xf6   :  { %v134_v33 = vrot.slane %v133_v31, 4  ;;  %v104_v34 = vrot.slane %v103_v32, 4 }
  0xf8   :  { %v135_v35 = vadd.f32 %v134_v33, %v133_v31  ;;  %v105_v36 = vadd.f32 %v104_v34, %v103_v32 }
  0xf9   :  { %v148_v37 = vpop.xlane.xlu1 %147  ;;  %v118_v38 = vpop.xlane.xlu0 %117 }
  0xfa   :  { %v136_v39 = vrot.slane %v135_v35, 2  ;;  %v106_v40 = vrot.slane %v105_v36, 2  ;;  %v149_v41 = vrot.slane %v148_v37, 4  ;;  %v119_v42 = vrot.slane %v118_v38, 4 }
  0xfc   :  { %v150_v43 = vadd.f32 %v149_v41, %v148_v37  ;;  %v120_v44 = vadd.f32 %v119_v42, %v118_v38  ;;  %v107_v45 = vadd.f32 %v106_v40, %v105_v36  ;;  %v137_v48 = vadd.f32 %v136_v39, %v135_v35 }
  0xfd   :  { %v178_v46 = vpop.xlane.xlu1 %177  ;;  %v163_v47 = vpop.xlane.xlu0 %162 }
  0xfe   :  { %v151_v49 = vrot.slane %v150_v43, 2  ;;  %v121_v50 = vrot.slane %v120_v44, 2  ;;  %v179_v51 = vrot.slane %v178_v46, 4  ;;  %v164_v52 = vrot.slane %v163_v47, 4 }
  0xff   :  { %v108_v53 = vrot.slane %v107_v45, 1  ;;  %v138_v61 = vrot.slane %v137_v48, 1 }
 0x100   :  { %v180_v54 = vadd.f32 %v179_v51, %v178_v46  ;;  %v165_v55 = vadd.f32 %v164_v52, %v163_v47  ;;  %v122_v56 = vadd.f32 %v121_v50, %v120_v44  ;;  %v152_v57 = vadd.f32 %v151_v49, %v150_v43 }
 0x101   :  { %v208_v58 = vpop.xlane.xlu1 %207  ;;  %v193_v59 = vpop.xlane.xlu0 %192  ;;  %v109_v60 = vadd.f32 %v108_v53, %v107_v45  ;;  %v139_v11 = vadd.f32 %v138_v61, %v137_v48 }
 0x102   :  { %v181_v62 = vrot.slane %v180_v54, 2  ;;  %v166_v63 = vrot.slane %v165_v55, 2  ;;  %v209_v0 = vrot.slane %v208_v58, 4  ;;  %v194_v1 = vrot.slane %v193_v59, 4 }
 0x103   :  { %450 = vpush %v109_v60  ;;  %v123_v2 = vrot.slane %v122_v56, 1  ;;  %v153_v3 = vrot.slane %v152_v57, 1 }
 0x104   :  { %v210_v4 = vadd.f32 %v209_v0, %v208_v58  ;;  %v195_v5 = vadd.f32 %v194_v1, %v193_v59  ;;  %v167_v6 = vadd.f32 %v166_v63, %v165_v55  ;;  %v182_v7 = vadd.f32 %v181_v62, %v180_v54 }
 0x105   :  { %v238_v8 = vpop.xlane.xlu1 %237  ;;  %v223_v9 = vpop.xlane.xlu0 %222  ;;  %v124_v10 = vadd.f32 %v123_v2, %v122_v56  ;;  %v154_v12 = vadd.f32 %v153_v3, %v152_v57  ;;  %v308_v0 = vlaneseq }
 0x106   :  { %v211_v13 = vrot.slane %v210_v4, 2  ;;  %v196_v14 = vrot.slane %v195_v5, 2  ;;  %v239_v15 = vrot.slane %v238_v8, 4  ;;  %v224_v16 = vrot.slane %v223_v9, 4 }
 0x107   :  { %452 = vpush %v124_v10  ;;  %v168_v17 = vrot.slane %v167_v6, 1  ;;  %v183_v18 = vrot.slane %v182_v7, 1  ;;  %v763_v1 = vand.u32 127, %v308_v0 }
 0x108   :  { %v240_v19 = vadd.f32 %v239_v15, %v238_v8  ;;  %v225_v20 = vadd.f32 %v224_v16, %v223_v9  ;;  %454 = vpush %v139_v11  ;;  %v197_v21 = vadd.f32 %v196_v14, %v195_v5  ;;  %v212_v22 = vadd.f32 %v211_v13, %v210_v4 }
 0x109   :  { %456 = vpush %v154_v12  ;;  %v169_v23 = vadd.f32 %v168_v17, %v167_v6  ;;  %v184_v24 = vadd.f32 %v183_v18, %v182_v7  ;;  %v251_v25 = vpop.xlane.xlu0 %250  ;;  %vm317_vm12 = vcmp.eq.s32.totalorder %v763_v1, 0  ;;  %vm327_vm13 = vcmp.eq.s32.totalorder %v763_v1, 1 }
 0x10a   :  { %v241_v26 = vrot.slane %v240_v19, 2  ;;  %v226_v27 = vrot.slane %v225_v20, 2  ;;  %v198_v28 = vrot.slane %v197_v21, 1  ;;  %v213_v29 = vrot.slane %v212_v22, 1 }
 0x10b   :  { %458 = vpush %v169_v23  ;;  %v252_v30 = vrot.slane %v251_v25, 4  ;;  %vm337_vm14 = vcmp.eq.s32.totalorder %v763_v1, 2  ;;  %vm347_vm15 = vcmp.eq.s32.totalorder %v763_v1, 3  ;;  %vm357_vm0 = vcmp.eq.s32.totalorder %v763_v1, 4 }
 0x10c   :  { %v242_v31 = vadd.f32 %v241_v26, %v240_v19  ;;  %460 = vpush %v184_v24  ;;  %v199_v32 = vadd.f32 %v198_v28, %v197_v21  ;;  %v214_v33 = vadd.f32 %v213_v29, %v212_v22  ;;  %v227_v34 = vadd.f32 %v226_v27, %v225_v20 }
 0x10d   :  { %v253_v35 = vadd.f32 %v252_v30, %v251_v25  ;;  %vm367_vm1 = vcmp.eq.s32.totalorder %v763_v1, 5  ;;  %vm377_vm2 = vcmp.eq.s32.totalorder %v763_v1, 6  ;;  %vm387_vm3 = vcmp.eq.s32.totalorder %v763_v1, 7 }
 0x10e   :  { %462 = vpush %v199_v32  ;;  %v228_v36 = vrot.slane %v227_v34, 1  ;;  %v243_v37 = vrot.slane %v242_v31, 1  ;;  %vm397_vm4 = vcmp.eq.s32.totalorder %v763_v1, 8  ;;  %vm407_vm5 = vcmp.eq.s32.totalorder %v763_v1, 9 }
 0x10f   :  { %464 = vpush %v214_v33  ;;  %v254_v38 = vrot.slane %v253_v35, 2 }
 0x110   :  { %v229_v39 = vadd.f32 %v228_v36, %v227_v34  ;;  %v244_v40 = vadd.f32 %v243_v37, %v242_v31 }
 0x111   :  { %v255_v41 = vadd.f32 %v254_v38, %v253_v35 }
 0x112   :  { %466 = vpush %v229_v39 }
 0x113   :  { %468 = vpush %v244_v40  ;;  %v256_v42 = vrot.slane %v255_v41, 1 }
 0x115   :  { %v257_v43 = vadd.f32 %v256_v42, %v255_v41 }
 0x117   :  { %470 = vpush %v257_v43 }
 0x134   :  { %s680_s2 = spop %450 }
 0x135   :  { %p268_p10 = scmp.gt.f32.partialorder %s680_s2, 0.0 }
 0x137   :  { %s269_s19 = scalar_select %p268_p10, 1.0, 0.0 }
 0x138   :  { %s685_s20 = spop %452 }
 0x139   :  { %p272_p11 = scmp.gt.f32.partialorder %s685_s20, 0.0  ;;  %s688_s21 = spop %454 }
 0x13a   :  { %p276_p12 = scmp.gt.f32.partialorder %s688_s21, 0.0  ;;  %s693_s24 = spop %456 }
 0x13b   :  { %s273_s22 = scalar_select %p272_p11, 1.0, 0.0 }
 0x13c   :  { %s277_s25 = scalar_select %p276_p12, 1.0, 0.0 }
 0x13d   :  { %s274_s23 = sadd.f32 %s273_s22, %s269_s19  ;;  %p280_p13 = scmp.gt.f32.partialorder %s693_s24, 0.0 }
 0x13e   :  { %s698_s27 = spop %458 }
 0x13f   :  { %s278_s26 = sadd.f32 %s277_s25, %s274_s23  ;;  %p284_p0 = scmp.gt.f32.partialorder %s698_s27, 0.0 }
 0x140   :  { %s281_s28 = scalar_select %p280_p13, 1.0, 0.0 }
 0x141   :  { %s703_s30 = spop %460  ;;  %s310_s23 = smax.f32 %s620_s15, %s680_s2 }
 0x142   :  { %s282_s29 = sadd.f32 %s281_s28, %s278_s26  ;;  %p288_p1 = scmp.gt.f32.partialorder %s703_s30, 0.0 }
 0x143   :  { %s285_s4 = scalar_select %p284_p0, 1.0, 0.0 }
 0x144   :  { %s708_s6 = spop %462  ;;  %s320_s26 = smax.f32 %s620_s15, %s685_s20 }
 0x145   :  { %s286_s5 = sadd.f32 %s285_s4, %s282_s29  ;;  %p292_p2 = scmp.gt.f32.partialorder %s708_s6, 0.0 }
 0x146   :  { %s289_s1 = scalar_select %p288_p1, 1.0, 0.0 }
 0x147   :  { %s713_s8 = spop %464  ;;  %s330_s29 = smax.f32 %s620_s15, %s688_s21 }
 0x148   :  { %s290_s7 = sadd.f32 %s289_s1, %s286_s5  ;;  %p296_p3 = scmp.gt.f32.partialorder %s713_s8, 0.0 }
 0x149   :  { %s293_s9 = scalar_select %p292_p2, 1.0, 0.0 }
 0x14a   :  { %s718_s11 = spop %466  ;;  %s340_s5 = smax.f32 %s620_s15, %s693_s24 }
 0x14b   :  { %s294_s10 = sadd.f32 %s293_s9, %s290_s7  ;;  %p300_p4 = scmp.gt.f32.partialorder %s718_s11, 0.0 }
 0x14c   :  { %s297_s12 = scalar_select %p296_p3, 1.0, 0.0 }
 0x14d   :  { %s723_s14 = spop %468  ;;  %s350_s7 = smax.f32 %s620_s15, %s698_s27 }
 0x14e   :  { %s298_s13 = sadd.f32 %s297_s12, %s294_s10  ;;  %p304_p5 = scmp.gt.f32.partialorder %s723_s14, 0.0 }
 0x14f   :  { %s301_s16 = scalar_select %p300_p4, 1.0, 0.0 }
 0x150   :  { %s305_s18 = scalar_select %p304_p5, 1.0, 0.0 }
 0x151   :  { %s302_s17 = sadd.f32 %s301_s16, %s298_s13  ;;  %s400_s22 = smax.f32 %s620_s15, %s723_s14 }
 0x152   :  { %s360_s10 = smax.f32 %s620_s15, %s703_s30  ;;  %s370_s13 = smax.f32 %s620_s15, %s708_s6 }
 0x153   :  { %s306_s0 = sadd.f32 %s305_s18, %s302_s17  ;;  %s380_s17 = smax.f32 %s620_s15, %s713_s8 }
 0x155   :  { %s731_s19 = smax.f32 %s620_s15, %s306_s0  ;;  %s390_s0 = smax.f32 %s620_s15, %s718_s11 }
 0x156   :  { %s401_s25 = smul.f32 %s400_s22, %s731_s19 }
 0x157   :  { %s311_s28 = smul.f32 %s310_s23, %s731_s19 }
 0x158   :  { %v402_v44 = vstv %s401_s25  ;;  %s321_s4 = smul.f32 %s320_s26, %s731_s19 }
 0x159   :  { %502 = vrcp.f32 %v402_v44  ;;  %v312_v45 = vstv %s311_s28  ;;  %s331_s1 = smul.f32 %s330_s29, %s731_s19 }
 0x15a   :  { %504 = vrcp.f32 %v312_v45  ;;  %v322_v46 = vstv %s321_s4  ;;  %s341_s9 = smul.f32 %s340_s5, %s731_s19 }
 0x15b   :  { %506 = vrcp.f32 %v322_v46  ;;  %v332_v47 = vstv %s331_s1  ;;  %s351_s12 = smul.f32 %s350_s7, %s731_s19 }
 0x15c   :  { %508 = vrcp.f32 %v332_v47  ;;  %v342_v48 = vstv %s341_s9  ;;  %s361_s16 = smul.f32 %s360_s10, %s731_s19 }
 0x15d   :  { %510 = vrcp.f32 %v342_v48  ;;  %v352_v49 = vstv %s351_s12  ;;  %s371_s18 = smul.f32 %s370_s13, %s731_s19 }
 0x15e   :  { %512 = vrcp.f32 %v352_v49  ;;  %v362_v50 = vstv %s361_s16  ;;  %s381_s22 = smul.f32 %s380_s17, %s731_s19 }
 0x15f   :  { %514 = vrcp.f32 %v362_v50  ;;  %v372_v51 = vstv %s371_s18  ;;  %s391_s23 = smul.f32 %s390_s0, %s731_s19  ;;  %s471_s19 = spop %470 }
 0x160   :  { %516 = vrcp.f32 %v372_v51  ;;  %v382_v52 = vstv %s381_s22  ;;  %s766_s25 = smax.f32 %s620_s15, %s471_s19  ;;  %s621_s18 = smov [#allocation9]  }
 0x161   :  { %518 = vrcp.f32 %v382_v52  ;;  %v392_v53 = vstv %s391_s23  ;;  %s417_s0 = sshll.u32 %s621_s18, 4  ;;  %s418_s0 = int_to_ptr.vmem [resolvable:$true] %s417_s0 }
 0x162   :  { %520 = vrcp.f32 %v392_v53  ;;  %s588_s6 = scalar_lea.vmem %s418_s0, 16  ;;  %s592_s8 = scalar_lea.vmem %s418_s0, 32 }
 0x163   :  { %v503_v54 = vpop.eup %502  ;;  %p589_p6 = scmp.ne.s32.totalorder %s418_s0, %s588_s6  ;;  %p593_p7 = scmp.lt.s32.totalorder %s418_s0, %s418_s0 }
 0x164   :  { %v505_v55 = vpop.eup %504  ;;  %p594_p8 = scmp.lt.s32.totalorder %s592_s8, %s588_s6 }
 0x165   :  { %v507_v56 = vpop.eup %506  ;;  %472 = vpush %v505_v55 }
 0x166   :  { %v509_v57 = vpop.eup %508  ;;  %474 = vpush %v507_v56  ;;  %p595_p9 = por %p594_p8, %p593_p7 }
 0x167   :  { %v511_v58 = vpop.eup %510  ;;  %476 = vpush %v509_v57 }
 0x168   :  { %v513_v59 = vpop.eup %512  ;;  %478 = vpush %v511_v58 }
 0x169   :  { %v515_v60 = vpop.eup %514  ;;  %480 = vpush %v513_v59 }
 0x16a   :  { %v517_v61 = vpop.eup %516  ;;  %482 = vpush %v515_v60 }
 0x16b   :  { %v519_v62 = vpop.eup %518  ;;  %484 = vpush %v517_v61 }
 0x16c   :  { %v521_v63 = vpop.eup %520  ;;  %486 = vpush %v519_v62 }
 0x16d   :  { %488 = vpush %v521_v63 }
 0x16e   :  { %490 = vpush %v503_v54 }
 0x196   :  { %s473_s26 = spop %472 }
 0x197   :  { %s315_s28 = smul.f32 %s473_s26, %s766_s25  ;;  %s475_s29 = spop %474 }
 0x198   :  { %s325_s4 = smul.f32 %s475_s29, %s766_s25  ;;  %s477_s5 = spop %476 }
 0x199   :  { %s825_s28 = smov (!%p268_p10, %s315_s28), 0.0  ;;  %s335_s15 = smul.f32 %s477_s5, %s766_s25 }
 0x19a   :  { %s827_s4 = smov (!%p272_p11, %s325_s4), 0.0  ;;  %v318_v2 = vstv %s825_s28  ;;  %s479_s1 = spop %478 }
 0x19b   :  { %v319_v3 = vsel %vm317_vm12, %v318_v2, 0.0  ;;  %v328_v4 = vstv %s827_s4  ;;  %s345_s7 = smul.f32 %s479_s1, %s766_s25  ;;  %s481_s9 = spop %480 }
 0x19c   :  { %v329_v5 = vsel %vm327_vm13, %v328_v4, %v319_v3  ;;  %s829_s15 = smov (!%p276_p12, %s335_s15), 0.0  ;;  %s355_s2 = smul.f32 %s481_s9, %s766_s25 }
 0x19d   :  { %s831_s7 = smov (!%p280_p13, %s345_s7), 0.0  ;;  %v338_v6 = vstv %s829_s15  ;;  %s483_s20 = spop %482 }
 0x19e   :  { %v339_v7 = vsel %vm337_vm14, %v338_v6, %v329_v5  ;;  %v348_v8 = vstv %s831_s7  ;;  %s365_s10 = smul.f32 %s483_s20, %s766_s25  ;;  %s485_s12 = spop %484 }
 0x19f   :  { %v349_v9 = vsel %vm347_vm15, %v348_v8, %v339_v7  ;;  %s833_s2 = smov (!%p284_p0, %s355_s2), 0.0  ;;  %s375_s21 = smul.f32 %s485_s12, %s766_s25 }
 0x1a0   :  { %s835_s10 = smov (!%p288_p1, %s365_s10), 0.0  ;;  %v358_v10 = vstv %s833_s2  ;;  %s487_s24 = spop %486 }
 0x1a1   :  { %v359_v11 = vsel %vm357_vm0, %v358_v10, %v349_v9  ;;  %v368_v12 = vstv %s835_s10  ;;  %s385_s13 = smul.f32 %s487_s24, %s766_s25  ;;  %s489_s16 = spop %488 }
 0x1a2   :  { %v369_v13 = vsel %vm367_vm1, %v368_v12, %v359_v11  ;;  %s837_s21 = smov (!%p292_p2, %s375_s21), 0.0  ;;  %s395_s27 = smul.f32 %s489_s16, %s766_s25 }
 0x1a3   :  { %s839_s13 = smov (!%p296_p3, %s385_s13), 0.0  ;;  %v378_v14 = vstv %s837_s21  ;;  %s491_s30 = spop %490 }
 0x1a4   :  { %v379_v15 = vsel %vm377_vm2, %v378_v14, %v369_v13  ;;  %v388_v16 = vstv %s839_s13  ;;  %s405_s17 = smul.f32 %s491_s30, %s766_s25  ;;  %s841_s27 = smov (!%p300_p4, %s395_s27), 0.0 }
 0x1a5   :  { %v389_v17 = vsel %vm387_vm3, %v388_v16, %v379_v15  ;;  %v398_v18 = vstv %s841_s27  ;;  %p596_p10 = pnand %p595_p9, %p589_p6 }
 0x1a6   :  { %s843_s17 = smov (!%p304_p5, %s405_s17), 0.0  ;;  %v399_v20 = vsel %vm397_vm4, %v398_v18, %v389_v17 }
 0x1a7   :  { %v408_v19 = vstv %s843_s17 }
 0x1a8   :  { %v409_v21 = vsel %vm407_vm5, %v408_v19, %v399_v20 }
 0x1a9   :  { %410 = vst [vmem:[#allocation9] sm:$0x1] %v409_v21 }
 0x1aa   :  { %599 = shalt.err (!%p596_p10)
}
 0x1ab   :  { %s600_s14 = scalar_lea.hbm %s823_s3, 16 }
 0x1ac   :  { %p601_p11 = scmp.ne.s32.totalorder %s823_s3, %s600_s14  ;;  %p604_p12 = scmp.lt.u32.totalorder %s600_s14, %s823_s3 }
 0x1ae   :  { %p606_p13 = pnand %p604_p12, %p601_p11 }
 0x1b0   :  { %609 = shalt.err (!%p606_p13)
}
 0x1b1   :  { %420 = dma.vmem_to_hbm [thread:$0]  %s418_s0, 16, %s823_s3, [#allocation5]  }
 0x1b2   :  { %614 = dma.done.wait [#allocation5], 16  }
 0x1b3   :  { %615 = vsyncadd [#allocation5], 4294967280 }
 0x1b4   :  { %424 = vsyncpa [#allocation4], 1 }
 0x1b5   :  { %425 = vsyncpa [#allocation7], 1 }
 0x1b6   :  { %426 = vsyncpa [#allocation5], 1 }

</bundles_post_ra>
